<compile_context>
chip_gen: v7x
topology: tpu7x:2x2x1
jax: 0.10.0
libtpu: 0.0.40
codegen_flags: <defaults>
</compile_context>

<pallas_src>
import jax
import jax.numpy as jnp
from jax.experimental import pallas as pl
from jax.experimental.pallas import tpu as pltpu


def _rup(x, m):
    return ((x + m - 1) // m) * m


def _divisors_desc(n):
    return [d for d in range(n, 0, -1) if n % d == 0]


# ----------------------------------------------------------------------------
# Fused matmul kernel: bf16 MXU, f32 acc, BN affine + residual + ReLU epilogue
# (1x1 convs, strided/7x7 im2col convs, phase ConvTranspose k2s2)
# ----------------------------------------------------------------------------

def _make_mm_kernel(relu, has_res, has_post):
    def kernel(*refs):
        a_ref, w_ref, s_ref, b_ref = refs[:4]
        idx = 4
        res_ref = post_ref = None
        if has_res:
            res_ref = refs[idx]
            idx += 1
        if has_post:
            post_ref = refs[idx]
            idx += 1
        o_ref, acc_ref = refs[idx], refs[idx + 1]

        @pl.when(pl.program_id(2) == 0)
        def _init():
            acc_ref[...] = jnp.zeros_like(acc_ref)

        acc_ref[...] += jnp.dot(a_ref[...], w_ref[...],
                                preferred_element_type=jnp.float32)

        @pl.when(pl.program_id(2) == pl.num_programs(2) - 1)
        def _fin():
            y = acc_ref[...] * s_ref[...] + b_ref[...]
            if has_res:
                y = y + res_ref[...].astype(jnp.float32)
            if relu:
                y = jnp.maximum(y, 0.0)
            if has_post:
                y = y + post_ref[...].astype(jnp.float32)
            o_ref[...] = y.astype(o_ref.dtype)

    return kernel


def _pick_tiles(M, Kp, Np):
    if M >= 4096 and M % 512 == 0:
        TM = 512
    elif M >= 1024 and M % 256 == 0:
        TM = 256
    elif M % 128 == 0:
        TM = 128
    else:
        TM = min(_rup(M, 8), 128)
    Mp = _rup(M, TM)
    TN = 256 if Np % 256 == 0 else 128
    # v7x megacore: make sure there are >= 2 parallel grid blocks when possible.
    if (Mp // TM) * (Np // TN) == 1 and Np >= 256:
        TN = 128
    TK = 128
    for cand in (512, 384, 256):
        if Kp % cand == 0:
            TK = cand
            break
    return TM, Mp, TN, TK


def matmul_bn_act(A, W, s, b, *, relu, res=None, post=None, out_dtype=jnp.bfloat16):
    """out = relu?((A @ W) * s + b [+ res]) [+ post]; returns (M, Np) (channel-padded)."""
    M, K = A.shape
    Kp, Np = W.shape
    TM, Mp, TN, TK = _pick_tiles(M, Kp, Np)

    A = A.astype(jnp.bfloat16)
    if K != Kp or M != Mp:
        A = jnp.pad(A, ((0, Mp - M), (0, Kp - K)))

    def _pad_rows(t):
        t = t.astype(jnp.bfloat16)
        if Mp != M:
            t = jnp.pad(t, ((0, Mp - M), (0, 0)))
        return t

    a_spec = pl.BlockSpec((TM, TK), lambda i, j, k: (i, k))
    w_spec = pl.BlockSpec((TK, TN), lambda i, j, k: (k, j))
    v_spec = pl.BlockSpec((1, TN), lambda i, j, k: (0, j))
    o_spec = pl.BlockSpec((TM, TN), lambda i, j, k: (i, j))

    operands = [A, W, s, b]
    in_specs = [a_spec, w_spec, v_spec, v_spec]
    has_res, has_post = res is not None, post is not None
    if has_res:
        operands.append(_pad_rows(res))
        in_specs.append(o_spec)
    if has_post:
        operands.append(_pad_rows(post))
        in_specs.append(o_spec)

    bytes_acc = int(Mp * Kp * 2 + Kp * Np * 2 + Mp * Np * 2
                    + (Mp * Np * 2 if has_res else 0)
                    + (Mp * Np * 2 if has_post else 0))
    cost = pl.CostEstimate(flops=int(2 * Mp * Np * Kp), transcendentals=0,
                           bytes_accessed=bytes_acc)

    out = pl.pallas_call(
        _make_mm_kernel(relu, has_res, has_post),
        out_shape=jax.ShapeDtypeStruct((Mp, Np), out_dtype),
        grid=(Mp // TM, Np // TN, Kp // TK),
        in_specs=in_specs,
        out_specs=o_spec,
        scratch_shapes=[pltpu.VMEM((TM, TN), jnp.float32)],
        compiler_params=pltpu.CompilerParams(
            dimension_semantics=("parallel", "parallel", "arbitrary")),
        cost_estimate=cost,
    )(*operands)
    if Mp != M:
        out = out[:M]
    return out


# ----------------------------------------------------------------------------
# Tap conv kernel: stride-1 kxk conv without materialized im2col.
# Input is delivered as flattened row-slabs (rows*pitch, Cin); the k*k shifted
# windows are static sublane slices of the VMEM block; f32 scratch accumulates
# over the Cin-chunk grid axis; BN affine + ReLU in the epilogue.
# ----------------------------------------------------------------------------

def _make_tap_kernel(offsets, relu):
    n_taps = len(offsets)

    def kernel(x_ref, w_ref, s_ref, b_ref, o_ref, acc_ref):
        k = pl.program_id(3)

        @pl.when(k == 0)
        def _init():
            acc_ref[...] = jnp.zeros_like(acc_ref)

        lo = acc_ref.shape[0]
        for t in range(n_taps):
            off = offsets[t]
            a = x_ref[0, 0, off:off + lo, :]
            acc_ref[...] += jnp.dot(a, w_ref[t], preferred_element_type=jnp.float32)

        @pl.when(k == pl.num_programs(3) - 1)
        def _fin():
            y = acc_ref[...] * s_ref[...] + b_ref[...]
            if relu:
                y = jnp.maximum(y, 0.0)
            o_ref[0, 0] = y.astype(o_ref.dtype)

    return kernel


def conv_taps_s1(x, cp, *, relu, budget_bytes=10 << 20):
    """Stride-1 kh x kw conv + folded BN (+ReLU) on channel-padded NHWC input."""
    kh, kw = cp["kh"], cp["kw"]
    pt, pb, pleft, pright = cp["pads"]
    W3 = cp["w"]                              # (kh*kw, Cinp, Np) bf16
    N, H, Wd, Cin = x.shape
    kt, Cinp, Np = W3.shape
    assert Cin == Cinp, (Cin, Cinp)
    assert kh - pt >= pb
    Wp = Wd + pleft + pright
    TCin = min(Cinp, 512)
    TCout = 256 if Np % 256 == 0 else 128

    def est(th):
        ls = (th + kh) * Wp
        lo = th * Wp
        return (2 * ls * TCin * 2 + 2 * lo * TCout * 2 + lo * TCout * 4
                + 2 * kt * TCin * TCout * 2 + 8 * TCout * 4)

    TH = 1
    for dcand in _divisors_desc(H):
        if est(dcand) <= budget_bytes:
            TH = dcand
            break
    nH = H // TH
    THs = TH + kh
    Ls, Lo = THs * Wp, TH * Wp

    # Spatial zero-pad (+1 extra zero row for the flat-window overrun), then build
    # per-row-tile slabs (only the (kh+1)-row halo is duplicated) and flatten.
    xpad = jnp.pad(x, ((0, 0), (pt, kh - pt), (pleft, pright), (0, 0)))
    slabs = jnp.stack([xpad[:, i * TH:i * TH + THs] for i in range(nH)], axis=1)
    slabs = slabs.reshape(N, nH, Ls, Cinp)

    offsets = tuple(dy * Wp + dx for dy in range(kh) for dx in range(kw))

    cost = pl.CostEstimate(
        flops=int(2 * N * H * Wp * kt * Cinp * Np), transcendentals=0,
        bytes_accessed=int(slabs.size * 2 * (Np // TCout)
                           + W3.size * 2 * N * nH + N * nH * Lo * Np * 2))

    out = pl.pallas_call(
        _make_tap_kernel(offsets, relu),
        out_shape=jax.ShapeDtypeStruct((N, nH, Lo, Np), jnp.bfloat16),
        grid=(N, nH, Np // TCout, Cinp // TCin),
        in_specs=[
            pl.BlockSpec((1, 1, Ls, TCin), lambda n, i, j, k: (n, i, 0, k)),
            pl.BlockSpec((kt, TCin, TCout), lambda n, i, j, k: (0, k, j)),
            pl.BlockSpec((1, TCout), lambda n, i, j, k: (0, j)),
            pl.BlockSpec((1, TCout), lambda n, i, j, k: (0, j)),
        ],
        out_specs=pl.BlockSpec((1, 1, Lo, TCout), lambda n, i, j, k: (n, i, 0, j)),
        scratch_shapes=[pltpu.VMEM((Lo, TCout), jnp.float32)],
        compiler_params=pltpu.CompilerParams(
            dimension_semantics=("parallel", "parallel", "parallel", "arbitrary")),
        cost_estimate=cost,
    )(slabs, W3, cp["s"], cp["b"])

    # Strip the per-row junk (padding) columns of the flat layout.
    out = out.reshape(N, nH, TH, Wp, Np).reshape(N, H, Wp, Np)[:, :, :Wd, :]
    return out


# ----------------------------------------------------------------------------
# Tiled elementwise kernels: 9-way max (maxpool) and fused add(+add)+ReLU
# ----------------------------------------------------------------------------

def _ew_tile(M, C, n_in):
    per_row = C * 2 * (n_in + 1) * 2
    cap = max(8, min(2048, ((6 << 20) // per_row) // 8 * 8))
    for t in (2048, 1024, 512, 256, 128, 64, 32, 16, 8):
        if t <= cap and M % t == 0:
            return t, M
    TM = min(cap, max(8, _rup(M, 8)))
    return TM, _rup(M, TM)


def _elementwise_call(kernel, operands, M, C, out_dtype):
    TM, Mp = _ew_tile(M, C, len(operands))
    ops = []
    for t in operands:
        if Mp != M:
            t = jnp.pad(t, ((0, Mp - M), (0, 0)))
        ops.append(t)
    spec = pl.BlockSpec((TM, C), lambda i: (i, 0))
    out = pl.pallas_call(
        kernel,
        out_shape=jax.ShapeDtypeStruct((Mp, C), out_dtype),
        grid=(Mp // TM,),
        in_specs=[spec] * len(ops),
        out_specs=spec,
        compiler_params=pltpu.CompilerParams(dimension_semantics=("parallel",)),
    )(*ops)
    return out[:M] if Mp != M else out


def _max9_kernel(*refs):
    o_ref = refs[-1]
    m = refs[0][...]
    for r in refs[1:-1]:
        m = jnp.maximum(m, r[...])
    o_ref[...] = m


def maxpool2d_3x3_s2_p1(x):
    """MaxPool2d(3, stride=2, pad=1) on NHWC (H, W even). Zero padding is safe because
    inputs are post-ReLU (>= 0)."""
    N, H, W, C = x.shape
    Ho, Wo = H // 2, W // 2
    xp = jnp.pad(x, ((0, 0), (1, 1), (1, 1), (0, 0)))
    phases = [xp[:, dy:dy + 2 * Ho:2, dx:dx + 2 * Wo:2, :].reshape(N * Ho * Wo, C)
              for dy in range(3) for dx in range(3)]
    out = _elementwise_call(_max9_kernel, phases, N * Ho * Wo, C, x.dtype)
    return out.reshape(N, Ho, Wo, C)


def _make_addact_kernel(has_post):
    def kernel(*refs):
        if has_post:
            a_ref, r_ref, p_ref, o_ref = refs
        else:
            a_ref, r_ref, o_ref = refs
        y = a_ref[...].astype(jnp.float32) + r_ref[...].astype(jnp.float32)
        y = jnp.maximum(y, 0.0)
        if has_post:
            y = y + p_ref[...].astype(jnp.float32)
        o_ref[...] = y.astype(o_ref.dtype)
    return kernel


def add_relu(a, res, post=None):
    """relu(a + res) [+ post] on matching NHWC channel-padded tensors."""
    N, H, W, C = a.shape
    M = N * H * W
    ops = [a.reshape(M, C), res.reshape(M, C)]
    if post is not None:
        ops.append(post.reshape(M, C))
    out = _elementwise_call(_make_addact_kernel(post is not None), ops, M, C, jnp.bfloat16)
    return out.reshape(N, H, W, C)


# ----------------------------------------------------------------------------
# Conv wrappers
# ----------------------------------------------------------------------------

def _extract_patches(x, kh, kw, stride, pad):
    if pad > 0:
        x = jnp.pad(x, ((0, 0), (pad, pad), (pad, pad), (0, 0)))
    N, Hp, Wpd, C = x.shape
    Ho = (Hp - kh) // stride + 1
    Wo = (Wpd - kw) // stride + 1
    cols = []
    for i in range(kh):
        for j in range(kw):
            cols.append(x[:, i:i + stride * (Ho - 1) + 1:stride,
                          j:j + stride * (Wo - 1) + 1:stride, :])
    patches = jnp.stack(cols, axis=3)          # (N, Ho, Wo, kh*kw, C)
    return patches.reshape(N * Ho * Wo, kh * kw * C), N, Ho, Wo


def conv1x1(x, cp, *, stride=1, relu, res=None, post=None, out_dtype=jnp.bfloat16):
    xs = x if stride == 1 else x[:, ::stride, ::stride, :]
    N, H, W, C = xs.shape
    M = N * H * W
    A = xs.reshape(M, C)
    r2 = None if res is None else res.reshape(M, res.shape[-1])
    p2 = None if post is None else post.reshape(M, post.shape[-1])
    y = matmul_bn_act(A, cp["w"], cp["s"], cp["b"], relu=relu, res=r2, post=p2,
                      out_dtype=out_dtype)
    return y.reshape(N, H, W, -1)


def conv_im2col(x, cp, *, stride, pad, relu, post=None, out_dtype=jnp.bfloat16):
    kh, kw = cp["kh"], cp["kw"]
    A, N, Ho, Wo = _extract_patches(x, kh, kw, stride, pad)
    w2d = cp["w"]
    if w2d.ndim == 3:                          # tap layout -> 2D im2col layout (no copy)
        w2d = w2d.reshape(-1, w2d.shape[-1])
    M = N * Ho * Wo
    p2 = None if post is None else post.reshape(M, post.shape[-1])
    y = matmul_bn_act(A, w2d, cp["s"], cp["b"], relu=relu, post=p2, out_dtype=out_dtype)
    return y.reshape(N, Ho, Wo, -1)


def conv3x3_bn_act(x, cp, *, stride=1, relu=True):
    if stride == 1:
        return conv_taps_s1(x, cp, relu=relu)
    # TODO(synk): stride-2 3x3 convs still use materialized im2col patches.
    return conv_im2col(x, cp, stride=stride, pad=1, relu=relu)


def _depth_to_space2(y, coutp):
    N, H, W, _ = y.shape
    y = y.reshape(N, H, W, 2, 2, coutp).transpose(0, 1, 3, 2, 4, 5)
    return y.reshape(N, 2 * H, 2 * W, coutp)


def convT_k2s2(x, cp, *, relu, out_dtype=jnp.bfloat16):
    """ConvTranspose2d(k=2, s=2) as one matmul (M,Cin)x(Cin,4*Cout) + depth-to-space."""
    N, H, W, C = x.shape
    A = x.reshape(N * H * W, C)
    y = matmul_bn_act(A, cp["w"], cp["s"], cp["b"], relu=relu, out_dtype=out_dtype)
    y = y.reshape(N, H, W, 4 * cp["coutp"])
    return _depth_to_space2(y, cp["coutp"])


def convT_k3s2(x, cp, *, relu=False):
    """ConvTranspose2d(k=3, s=2, p=1, op=1) as a phase-combined 2x2 stride-1 conv
    (bottom/right pad) + depth-to-space."""
    y = conv_taps_s1(x, cp, relu=relu)         # (N, H, W, 4*coutp)
    return _depth_to_space2(y, cp["coutp"])


# ----------------------------------------------------------------------------
# Deterministic parameter construction (mirrors RedNet.__init__ shapes)
# ----------------------------------------------------------------------------

class _PG:
    def __init__(self, seed=0):
        self._key = jax.random.PRNGKey(seed)

    def key(self):
        self._key, k = jax.random.split(self._key)
        return k


def _make_bn_folded(pg, c, eps=1e-5):
    gamma = 1.0 + 0.1 * jax.random.normal(pg.key(), (c,), jnp.float32)
    beta = 0.1 * jax.random.normal(pg.key(), (c,), jnp.float32)
    mean = 0.1 * jax.random.normal(pg.key(), (c,), jnp.float32)
    var = 1.0 + 0.1 * jnp.abs(jax.random.normal(pg.key(), (c,), jnp.float32))
    scale = gamma / jnp.sqrt(var + eps)
    bias = beta - mean * scale
    return scale, bias


def _make_conv_w(pg, cin, cout, k):
    fan_in = cin * k * k
    return jax.random.normal(pg.key(), (k, k, cin, cout), jnp.float32) * jnp.sqrt(2.0 / fan_in)


def _make_convT_WT(pg, cin, cout, k):
    fan_in = cin * k * k
    return jax.random.normal(pg.key(), (cin, cout, k, k), jnp.float32) * jnp.sqrt(2.0 / fan_in)


def _prep_scale_bias(scale, bias, cout, Np, phases=1):
    s = jnp.zeros((1, phases * Np), jnp.float32)
    b = jnp.zeros((1, phases * Np), jnp.float32)
    for ph in range(phases):
        s = s.at[0, ph * Np:ph * Np + cout].set(scale.astype(jnp.float32))
        b = b.at[0, ph * Np:ph * Np + cout].set(bias.astype(jnp.float32))
    return s, b


def make_conv1x1_bn(pg, cin, cout):
    w = _make_conv_w(pg, cin, cout, 1)[0, 0]
    scale, bias = _make_bn_folded(pg, cout)
    Cinp, Np = _rup(cin, 128), _rup(cout, 128)
    w2 = jnp.zeros((Cinp, Np), jnp.bfloat16).at[:cin, :cout].set(w.astype(jnp.bfloat16))
    s, b = _prep_scale_bias(scale, bias, cout, Np)
    return {"kind": "1x1", "w": w2, "s": s, "b": b, "cout": cout}


def make_conv3x3_bn(pg, cin, cout):
    w = _make_conv_w(pg, cin, cout, 3)
    scale, bias = _make_bn_folded(pg, cout)
    Cinp, Np = _rup(cin, 128), _rup(cout, 128)
    w3 = jnp.zeros((9, Cinp, Np), jnp.bfloat16).at[:, :cin, :cout].set(
        w.reshape(9, cin, cout).astype(jnp.bfloat16))
    s, b = _prep_scale_bias(scale, bias, cout, Np)
    return {"kind": "tap", "w": w3, "s": s, "b": b, "cout": cout,
            "kh": 3, "kw": 3, "pads": (1, 1, 1, 1)}


def make_conv7x7_bn(pg, cin, cout):
    w = _make_conv_w(pg, cin, cout, 7)
    scale, bias = _make_bn_folded(pg, cout)
    K = 49 * cin
    Kp, Np = _rup(K, 128), _rup(cout, 128)
    w2 = jnp.zeros((Kp, Np), jnp.bfloat16).at[:K, :cout].set(
        w.reshape(K, cout).astype(jnp.bfloat16))
    s, b = _prep_scale_bias(scale, bias, cout, Np)
    return {"kind": "im2col", "w": w2, "s": s, "b": b, "cout": cout, "kh": 7, "kw": 7}


def make_convT2_bn(pg, cin, cout, with_bn=True):
    WT = _make_convT_WT(pg, cin, cout, 2)      # (cin, cout, 2, 2)
    if with_bn:
        scale, bias = _make_bn_folded(pg, cout)
    else:
        scale = jnp.ones((cout,), jnp.float32)
        bias = 0.1 * jax.random.normal(pg.key(), (cout,), jnp.float32)
    Cinp, Np = _rup(cin, 128), _rup(cout, 128)
    w = jnp.zeros((Cinp, 4 * Np), jnp.float32)
    for a in range(2):
        for b_ in range(2):
            c0 = (a * 2 + b_) * Np
            w = w.at[:cin, c0:c0 + cout].set(WT[:, :, a, b_])
    s, b = _prep_scale_bias(scale, bias, cout, Np, phases=4)
    return {"kind": "phase_mm", "w": w.astype(jnp.bfloat16), "s": s, "b": b,
            "cout": cout, "coutp": Np}


def make_convT3_bn(pg, cin, cout):
    WT = _make_convT_WT(pg, cin, cout, 3)
    Wf = jnp.flip(WT, axis=(2, 3)).transpose(2, 3, 0, 1)    # (3,3,cin,cout)
    scale, bias = _make_bn_folded(pg, cout)
    Cinp, Np = _rup(cin, 128), _rup(cout, 128)
    w = jnp.zeros((4, Cinp, 4 * Np), jnp.float32)

    def ridx(phase, d):
        if d == 0:
            return 1 if phase == 0 else 0
        return None if phase == 0 else 2

    for dy in range(2):
        for dx in range(2):
            t = dy * 2 + dx
            for a in range(2):
                for b_ in range(2):
                    u, v = ridx(a, dy), ridx(b_, dx)
                    if u is None or v is None:
                        continue
                    c0 = (a * 2 + b_) * Np
                    w = w.at[t, :cin, c0:c0 + cout].set(Wf[u, v])
    s, b = _prep_scale_bias(scale, bias, cout, Np, phases=4)
    return {"kind": "phase_tap", "w": w.astype(jnp.bfloat16), "s": s, "b": b,
            "cout": cout, "coutp": Np, "kh": 2, "kw": 2, "pads": (0, 1, 0, 1)}


def make_bottleneck(pg, inplanes, planes, stride, with_ds):
    p = {"conv1": make_conv1x1_bn(pg, inplanes, planes),
         "conv2": make_conv3x3_bn(pg, planes, planes),
         "conv3": make_conv1x1_bn(pg, planes, planes * 4),
         "stride": stride}
    if with_ds:
        p["ds"] = make_conv1x1_bn(pg, inplanes, planes * 4)
    return p


def make_layer(pg, inplanes, planes, blocks, stride=1):
    with_ds = stride != 1 or inplanes != planes * 4
    ps = [make_bottleneck(pg, inplanes, planes, stride, with_ds)]
    inplanes = planes * 4
    for _ in range(1, blocks):
        ps.append(make_bottleneck(pg, inplanes, planes, 1, False))
    return ps, inplanes


def make_transblock(pg, inplanes, planes, stride, with_up):
    t2 = with_up and stride != 1
    p = {"conv1": make_conv3x3_bn(pg, inplanes, inplanes), "t2": t2}
    if t2:
        p["conv2"] = make_convT3_bn(pg, inplanes, planes)
    else:
        p["conv2"] = make_conv3x3_bn(pg, inplanes, planes)
    if with_up:
        if stride != 1:
            p["up"] = make_convT2_bn(pg, inplanes, planes)
            p["up_t"] = True
        else:
            p["up"] = make_conv1x1_bn(pg, inplanes, planes)
            p["up_t"] = False
    return p


def make_transpose_layer(pg, inplanes, planes, blocks, stride=1):
    with_up = (stride != 1) or (inplanes != planes)
    ps = [make_transblock(pg, inplanes, inplanes, 1, False) for _ in range(blocks - 1)]
    ps.append(make_transblock(pg, inplanes, planes, stride, with_up))
    return ps, planes


def build_rednet_params(seed=0, num_classes=40):
    pg = _PG(seed)
    P = {"num_classes": num_classes}
    P["conv1"] = make_conv7x7_bn(pg, 3, 64)
    inpl = 64
    P["layer1"], inpl = make_layer(pg, inpl, 64, 3)
    P["layer2"], inpl = make_layer(pg, inpl, 128, 4, 2)
    P["layer3"], inpl = make_layer(pg, inpl, 256, 6, 2)
    P["layer4"], inpl = make_layer(pg, inpl, 512, 3, 2)
    P["conv1_d"] = make_conv7x7_bn(pg, 1, 64)
    inpl = 64
    P["layer1_d"], inpl = make_layer(pg, inpl, 64, 3)
    P["layer2_d"], inpl = make_layer(pg, inpl, 128, 4, 2)
    P["layer3_d"], inpl = make_layer(pg, inpl, 256, 6, 2)
    P["layer4_d"], inpl = make_layer(pg, inpl, 512, 3, 2)
    inpl = 512
    P["deconv1"], inpl = make_transpose_layer(pg, inpl, 256, 6, 2)
    P["deconv2"], inpl = make_transpose_layer(pg, inpl, 128, 4, 2)
    P["deconv3"], inpl = make_transpose_layer(pg, inpl, 64, 3, 2)
    P["deconv4"], inpl = make_transpose_layer(pg, inpl, 64, 3, 2)
    P["agant0"] = make_conv1x1_bn(pg, 64, 64)
    P["agant1"] = make_conv1x1_bn(pg, 64 * 4, 64)
    P["agant2"] = make_conv1x1_bn(pg, 128 * 4, 128)
    P["agant3"] = make_conv1x1_bn(pg, 256 * 4, 256)
    P["agant4"] = make_conv1x1_bn(pg, 512 * 4, 512)
    inpl = 64
    P["final_conv"], inpl = make_transpose_layer(pg, inpl, 64, 3, 1)
    P["final_deconv"] = make_convT2_bn(pg, inpl, num_classes, with_bn=False)
    return P


# ----------------------------------------------------------------------------
# Forward pass
# ----------------------------------------------------------------------------

def bottleneck_fwd(x, p, post=None):
    stride = p["stride"]
    out = conv1x1(x, p["conv1"], relu=True)
    out = conv3x3_bn_act(out, p["conv2"], stride=stride, relu=True)
    residual = conv1x1(x, p["ds"], stride=stride, relu=False) if "ds" in p else x
    # relu(bn3(conv3(out)) + residual) [+ post] fused into the matmul epilogue.
    return conv1x1(out, p["conv3"], relu=True, res=residual, post=post)


def layer_fwd(x, blocks, post=None):
    n = len(blocks)
    for i, p in enumerate(blocks):
        x = bottleneck_fwd(x, p, post=post if i == n - 1 else None)
    return x


def transblock_fwd(x, p, post=None):
    out = conv3x3_bn_act(x, p["conv1"], stride=1, relu=True)
    if "up" in p:
        if p["up_t"]:
            residual = convT_k2s2(x, p["up"], relu=False)
        else:
            residual = conv1x1(x, p["up"], relu=False)
    else:
        residual = x
    if p["t2"]:
        y = convT_k3s2(out, p["conv2"], relu=False)
    else:
        y = conv3x3_bn_act(out, p["conv2"], stride=1, relu=False)
    return add_relu(y, residual, post)


def trans_layer_fwd(x, blocks, post=None):
    n = len(blocks)
    for i, p in enumerate(blocks):
        x = transblock_fwd(x, p, post=post if i == n - 1 else None)
    return x


def rednet_forward(P, rgb_nchw, depth_nchw):
    """rgb: (N,3,H,W), depth: (N,1,H,W) float32 NCHW  ->  (N,num_classes,H,W) float32."""
    num_classes = P["num_classes"]
    rgb = jnp.transpose(rgb_nchw, (0, 2, 3, 1)).astype(jnp.bfloat16)
    depth = jnp.transpose(depth_nchw, (0, 2, 3, 1)).astype(jnp.bfloat16)

    # ---- downsample path ----
    d = conv_im2col(depth, P["conv1_d"], stride=2, pad=3, relu=True)
    fuse0 = conv_im2col(rgb, P["conv1"], stride=2, pad=3, relu=True, post=d)

    x = maxpool2d_3x3_s2_p1(fuse0)
    d = maxpool2d_3x3_s2_p1(d)

    d = layer_fwd(d, P["layer1_d"])
    fuse1 = layer_fwd(x, P["layer1"], post=d)
    d = layer_fwd(d, P["layer2_d"])
    fuse2 = layer_fwd(fuse1, P["layer2"], post=d)
    d = layer_fwd(d, P["layer3_d"])
    fuse3 = layer_fwd(fuse2, P["layer3"], post=d)
    d = layer_fwd(d, P["layer4_d"])
    fuse4 = layer_fwd(fuse3, P["layer4"], post=d)

    agant4 = conv1x1(fuse4, P["agant4"], relu=True)

    # ---- upsample path (decoder skip adds = post-ReLU adds) ----
    x = trans_layer_fwd(agant4, P["deconv1"], post=conv1x1(fuse3, P["agant3"], relu=True))
    x = trans_layer_fwd(x, P["deconv2"], post=conv1x1(fuse2, P["agant2"], relu=True))
    x = trans_layer_fwd(x, P["deconv3"], post=conv1x1(fuse1, P["agant1"], relu=True))
    x = trans_layer_fwd(x, P["deconv4"], post=conv1x1(fuse0, P["agant0"], relu=True))
    x = trans_layer_fwd(x, P["final_conv"])

    out = convT_k2s2(x, P["final_deconv"], relu=False, out_dtype=jnp.float32)
    out = out[..., :num_classes]
    return jnp.transpose(out, (0, 3, 1, 2))


# ----------------------------------------------------------------------------
# Main
# ----------------------------------------------------------------------------

if __name__ == "__main__":
    key = jax.random.PRNGKey(0)
    k1, k2 = jax.random.split(key)
    B, H, W = 2, 32, 32   # H, W must be divisible by 32 (5 stride-2 stages)
    rgb = jax.random.normal(k1, (B, 3, H, W), jnp.float32)
    depth = jax.random.normal(k2, (B, 1, H, W), jnp.float32)

    params = build_rednet_params(seed=0, num_classes=40)
    scores = rednet_forward(params, rgb, depth)
    scores = jax.block_until_ready(scores)
    assert scores.shape == (B, 40, H, W), scores.shape
    assert bool(jnp.all(jnp.isfinite(scores)))
    print("KERNEL_OK")
</pallas_src>

<mosaic_0001>
module attributes {stable_mosaic.version = 11 : i64} {
  func.func @kernel(%arg0: i32, %arg1: i32, %arg2: i32, %arg3: memref<128x128xbf16, #tpu.memory_space<vmem>>, %arg4: memref<128x128xbf16, #tpu.memory_space<vmem>>, %arg5: memref<1x128xf32, #tpu.memory_space<vmem>>, %arg6: memref<1x128xf32, #tpu.memory_space<vmem>>, %arg7: memref<128x128xbf16, #tpu.memory_space<vmem>>, %arg8: memref<128x128xf32, #tpu.memory_space<vmem>>) attributes {dimension_semantics = [#tpu.dimension_semantics<parallel>, #tpu.dimension_semantics<parallel>, #tpu.dimension_semantics<arbitrary>], iteration_bounds = array<i64: 4, 1, 1>, scalar_prefetch = 0 : i64, scratch_operands = 1 : i64, tpu.core_type = #tpu.core_type<tc>, window_params = [{transform_indices = @transform_0, window_bounds = array<i64: 128, 128>}, {transform_indices = @transform_1, window_bounds = array<i64: 128, 128>}, {transform_indices = @transform_2, window_bounds = array<i64: 1, 128>}, {transform_indices = @transform_3, window_bounds = array<i64: 1, 128>}, {transform_indices = @transform_4, window_bounds = array<i64: 128, 128>}]} {
    %c0_i32 = arith.constant 0 : i32
    %0 = arith.cmpi eq, %arg2, %c0_i32 : i32
    %1 = arith.extui %0 : i1 to i32
    %c0_i32_0 = arith.constant 0 : i32
    %2 = arith.cmpi ne, %1, %c0_i32_0 : i32
    scf.if %2 {
      %cst_10 = arith.constant 0.000000e+00 : f32
      %12 = vector.broadcast %cst_10 : f32 to vector<128x128xf32>
      %c0_11 = arith.constant 0 : index
      %c0_12 = arith.constant 0 : index
      %13 = vector.load %arg8[%c0_11, %c0_12] : memref<128x128xf32, #tpu.memory_space<vmem>>, vector<128x128xf32>
      tpu.vector_store %arg8[%c0_11, %c0_12], %12 {strides = array<i32>} : memref<128x128xf32, #tpu.memory_space<vmem>>, vector<128x128xf32>,
    } else {
    }
    %c0 = arith.constant 0 : index
    %c0_1 = arith.constant 0 : index
    %3 = vector.load %arg8[%c0, %c0_1] : memref<128x128xf32, #tpu.memory_space<vmem>>, vector<128x128xf32>
    %c0_2 = arith.constant 0 : index
    %c0_3 = arith.constant 0 : index
    %4 = vector.load %arg3[%c0_2, %c0_3] : memref<128x128xbf16, #tpu.memory_space<vmem>>, vector<128x128xbf16>
    %c0_4 = arith.constant 0 : index
    %c0_5 = arith.constant 0 : index
    %5 = vector.load %arg4[%c0_4, %c0_5] : memref<128x128xbf16, #tpu.memory_space<vmem>>, vector<128x128xbf16>
    %cst = arith.constant dense<0.000000e+00> : vector<128x128xf32>
    %6 = tpu.matmul %4, %5, %cst {dimension_numbers = #tpu.dot_dimension_numbers<[1], [0], [0], [1], [0, 0, 1, 1], [], []>} : vector<128x128xbf16>, vector<128x128xbf16>, vector<128x128xf32> -> vector<128x128xf32>
    %7 = arith.addf %3, %6 : vector<128x128xf32>
    %c0_6 = arith.constant 0 : index
    %c0_7 = arith.constant 0 : index
    %8 = vector.load %arg8[%c0_6, %c0_7] : memref<128x128xf32, #tpu.memory_space<vmem>>, vector<128x128xf32>
    tpu.vector_store %arg8[%c0_6, %c0_7], %7 {strides = array<i32>} : memref<128x128xf32, #tpu.memory_space<vmem>>, vector<128x128xf32>,
    %c0_i32_8 = arith.constant 0 : i32
    %9 = arith.cmpi eq, %arg2, %c0_i32_8 : i32
    %10 = arith.extui %9 : i1 to i32
    %c0_i32_9 = arith.constant 0 : i32
    %11 = arith.cmpi ne, %10, %c0_i32_9 : i32
    scf.if %11 {
      %c0_10 = arith.constant 0 : index
      %c0_11 = arith.constant 0 : index
      %12 = vector.load %arg8[%c0_10, %c0_11] : memref<128x128xf32, #tpu.memory_space<vmem>>, vector<128x128xf32>
      %c0_12 = arith.constant 0 : index
      %c0_13 = arith.constant 0 : index
      %13 = vector.load %arg5[%c0_12, %c0_13] : memref<1x128xf32, #tpu.memory_space<vmem>>, vector<1x128xf32>
      %14 = vector.broadcast %13 : vector<1x128xf32> to vector<128x128xf32>
      %15 = arith.mulf %12, %14 : vector<128x128xf32>
      %c0_14 = arith.constant 0 : index
      %c0_15 = arith.constant 0 : index
      %16 = vector.load %arg6[%c0_14, %c0_15] : memref<1x128xf32, #tpu.memory_space<vmem>>, vector<1x128xf32>
      %17 = vector.broadcast %16 : vector<1x128xf32> to vector<128x128xf32>
      %18 = arith.addf %15, %17 : vector<128x128xf32>
      %cst_16 = arith.constant 0.000000e+00 : f32
      %19 = vector.broadcast %cst_16 : f32 to vector<128x128xf32>
      %20 = arith.maximumf %18, %19 : vector<128x128xf32>
      %21 = arith.truncf %20 : vector<128x128xf32> to vector<128x128xbf16>
      %c0_17 = arith.constant 0 : index
      %c0_18 = arith.constant 0 : index
      %22 = vector.load %arg7[%c0_17, %c0_18] : memref<128x128xbf16, #tpu.memory_space<vmem>>, vector<128x128xbf16>
      tpu.vector_store %arg7[%c0_17, %c0_18], %21 {strides = array<i32>} : memref<128x128xbf16, #tpu.memory_space<vmem>>, vector<128x128xbf16>,
    } else {
    }
    return
  }
  func.func @transform_0(%arg0: i32, %arg1: i32, %arg2: i32) -> (i32, i32) {
    %c0_i32 = arith.constant 0 : i32
    return %arg0, %arg2 : i32, i32
  }
  func.func @transform_1(%arg0: i32, %arg1: i32, %arg2: i32) -> (i32, i32) {
    %c0_i32 = arith.constant 0 : i32
    return %arg2, %arg1 : i32, i32
  }
  func.func @transform_2(%arg0: i32, %arg1: i32, %arg2: i32) -> (i32, i32) {
    %c0_i32 = arith.constant 0 : i32
    %c0_i32_0 = arith.constant 0 : i32
    return %c0_i32, %arg1 : i32, i32
  }
  func.func @transform_3(%arg0: i32, %arg1: i32, %arg2: i32) -> (i32, i32) {
    %c0_i32 = arith.constant 0 : i32
    %c0_i32_0 = arith.constant 0 : i32
    return %c0_i32, %arg1 : i32, i32
  }
  func.func @transform_4(%arg0: i32, %arg1: i32, %arg2: i32) -> (i32, i32) {
    %c0_i32 = arith.constant 0 : i32
    return %arg0, %arg1 : i32, i32
  }
}

</mosaic_0001>

<bundles_post_ra>
// kernel: tpu_custom_call.1
= control target key start
LH: loop header
LB: loop body
LE: loop exit
PB: predicated region body
PF: predicated region fallthrough
CT: control target
= control target key end

     0   :  { %9 = vsyncpa [#allocation4], 0  ;;  %s1618_s0 = inlined_call_operand.hbm [shape: bf16[512,128], index: 0, kind: input, shape index: {}]   ;;  %s1619_s1 = inlined_call_operand.hbm [shape: bf16[128,128], index: 1, kind: input, shape index: {}]   ;;  %s1620_s2 = inlined_call_operand.vmem [shape: f32[1,128], index: 2, kind: input, shape index: {}]   ;;  %s1621_s3 = inlined_call_operand.vmem [shape: f32[1,128], index: 3, kind: input, shape index: {}]   ;;  %s1622_s4 = inlined_call_operand.hbm [shape: bf16[512,128], index: 4, kind: output, shape index: {}]  }
   0x1   :  { %11 = vsyncpa [#allocation4 + $0x1], 0 }
   0x2   :  { %12 = vsyncpa [#allocation7], 0 }
   0x3   :  { %13 = vsyncpa [#allocation5], 0 }
   0x4   :  { %15 = vsyncpa [#allocation5 + $0x1], 0  ;;  %s1346_s15 = smov 0   ;;  %s1348_s16 = smov 0  }
   0x5   :  { %s1350_s17 = smov 0   ;;  %s1352_s18 = smov 0  }
   0x6   :  { %s1354_s19 = smov 0   ;;  %s1356_s20 = smov 0  }
   0x7 LB: > { %s893_s21 = sadd.s32 4294967295, %s1312_s20   ;;  %s894_s22 = sadd.s32 4294967294, %s1312_s20   ;;  %s1312_s20 = sphi %s1356_s20, %s21_s20   ;;  %s1308_s19 = sphi %s1354_s19, %s1645_s19   ;;  %s1304_s18 = sphi %s1352_s18, %s1644_s18   ;;  %s1300_s17 = sphi %s1350_s17, %s1643_s17   ;;  %s1296_s16 = sphi %s1348_s16, %s1642_s16   ;;  %s1292_s15 = sphi %s1346_s15, %s1641_s15  }
   0x8   : > { %p62_p0 = scmp.ne.s32.totalorder %s1296_s16, %s1292_s15  ;;  %p1380_p1 = scmp.eq.s32.totalorder %s893_s21, 0 }
   0x9   : > { %p1384_p2 = scmp.eq.s32.totalorder %s893_s21, 3  ;;  %p174_p3 = scmp.eq.s32.totalorder %s894_s22, 3 }
   0xa   : > { %s1627_s23 = scalar_select %p1380_p1, 1, 0 }
   0xb   : > { %s1628_s24 = scalar_select %p1384_p2, 1, 0 }
   0xc   : > { %p1390_p4 = por %p1380_p1, %p62_p0  ;;  %p895_p5 = scmp.ge.s32.totalorder %s1312_s20, 1 }
   0xd   : > { %p1395_p6 = por %p174_p3, %p62_p0  ;;  %p181_p7 = scmp.lt.s32.totalorder %s1312_s20, 5 }
   0xe   : > { %s1629_s25 = scalar_select %p1390_p4, 1, 0 }
   0xf   : > { %s1630_s26 = scalar_select %p1395_p6, 1, 0 }
  0x10   : > { %p1400_p8 = pnand %p895_p5, %p181_p7  ;;  %s1314_s28 = smov [#allocation6]  }
  0x11   : > { %s197_s29 = sshll.u32 %s1314_s28, 4  ;;  %s40_s5 = sadd.s32 1, %s1308_s19  ;;  %s198_s29 = int_to_ptr.vmem [resolvable:$true] %s197_s29 }
  0x12   : > { %s1631_s27 = scalar_select %p1400_p8, 1, 0 }
  0x13   : > { %p1083_p9 = pneg %p1400_p8  ;;  %s1168_s8 = scalar_lea.hbm %s1619_s1, 1024 }
  0x14   : > { %p1169_p11 = scmp.ne.s32.totalorder %s1619_s1, %s1168_s8  ;;  %p1175_p3 = scmp.lt.u32.totalorder %s1168_s8, %s1619_s1 }
  0x15   : > { %p1408_p10 = pnand %p1083_p9, %p1380_p1 }
  0x17   : > { %p1170_p12 = pneg %p1408_p10 }
  0x19   : > { %p1171_p13 = pnand %p1170_p12, %p1169_p11 }
  0x1b   : > { %p1172_p0 = pneg %p1171_p13 }
  0x1d   : > { %p1177_p5 = pnand %p1175_p3, %p1172_p0 }
  0x1f   : > { %1180 = shalt.err (!%p1177_p5)
}
  0x20   : > { %s1181_s13 = scalar_lea.vmem %s198_s29, 1024  ;;  %p1189_p1 = scmp.lt.s32.totalorder %s198_s29, %s198_s29 }
  0x21   : > { %p1182_p7 = scmp.ne.s32.totalorder %s198_s29, %s1181_s13  ;;  %p1190_p4 = scmp.lt.s32.totalorder %s1181_s13, %s1181_s13 }
  0x23   : > { %p1184_p9 = pnand %p1182_p7, %p1170_p12  ;;  %p1191_p8 = por %p1190_p4, %p1189_p1 }
  0x25   : > { %p1185_p6 = pneg %p1184_p9 }
  0x27   : > { %p1192_p2 = pnand %p1191_p8, %p1185_p6 }
  0x29   : > { %1195 = shalt.err (!%p1192_p2)
}
  0x2a   : > { %s1315_s14 = smov 64   ;;  %s1316_s21 = smov 4  }
  0x2b   : > { %1086 = dma.hbm_to_vmem [thread:$0]  (!%p1408_p10), %s1619_s1, 1024, %s198_s29, [#allocation7], %s1315_s14, %s1315_s14, %s1316_s21  }
  0x2c   : > { %p42_p1 = scmp.ge.s32.totalorder %s40_s5, 4  ;;  %s49_s6 = sadd.s32 1, %s1300_s17 }
  0x2d   : > { %p56_p2 = scmp.ne.s32.totalorder %s1300_s17, %s1296_s16  ;;  %p57_p4 = scmp.eq.s32.totalorder %s1312_s20, 0 }
  0x2e   : > { %s1647_s5 = smov (%p42_p1, %s40_s5), 0  ;;  %p1634_p8 = scmp.ne.s32.totalorder %s1628_s24, 0 }
  0x2f   : > { %p1438_p6 = por %p57_p4, %p56_p2  ;;  %s44_s8 = ssub.s32 %s1308_s19, %s1647_s5 }
  0x30   : > { %p1444_p11 = por %p1634_p8, %p56_p2  ;;  %p1096_p12 = scmp.lt.s32.totalorder %s1312_s20, 4 }
  0x31   : > { %p47_p10 = scmp.eq.s32.totalorder %s44_s8, 0  ;;  %s223_s29 = sand.u32 1, %s1300_s17  }
  0x32   : > { %s900_s9 = sshll.u32 %s223_s29, 6  ;;  %s946_s11 = sshll.u32 %s1308_s19, 10 }
  0x33   : > { %s1453_s10 = scalar_select %p47_p10, %s1300_s17, %s49_s6  }
  0x34   : > { %s1459_s22 = scalar_lea.hbm %s1618_s0, %s946_s11  ;;  %s227_s24 = scalar_lea.vmem [#allocation3], %s900_s9 }
  0x35   : > { %s235_s28 = sshll.u32 %s227_s24, 4  ;;  %p1465_p13 = pnand %p1096_p12, %p1438_p6  ;;  %s1461_s28 = int_to_ptr.vmem [resolvable:$true] %s235_s28 }
  0x36   : > { %s1469_s6 = scalar_lea.sflag [#allocation4], %s223_s29  ;;  %s1196_s12 = scalar_lea.hbm %s1459_s22, 1024 }
  0x37   : > { %p1197_p0 = scmp.ne.s32.totalorder %s1459_s22, %s1196_s12  ;;  %p1198_p3 = pneg %p1465_p13 }
  0x38   : > { %s1201_s7 = scalar_lea.hbm %s1618_s0, 4096  ;;  %p1202_p9 = scmp.lt.u32.totalorder %s1459_s22, %s1618_s0 }
  0x39   : > { %p1199_p5 = pnand %p1198_p3, %p1197_p0  ;;  %p1203_p1 = scmp.lt.u32.totalorder %s1201_s7, %s1196_s12 }
  0x3a   : > { %p1205_p4 = scmp.lt.u32.totalorder %s1196_s12, %s1459_s22 }
  0x3b   : > { %p1200_p7 = pneg %p1199_p5  ;;  %p1204_p2 = por %p1203_p1, %p1202_p9 }
  0x3d   : > { %p1206_p6 = por %p1205_p4, %p1204_p2 }
  0x3f   : > { %p1207_p8 = pnand %p1206_p6, %p1200_p7 }
  0x41   : > { %1210 = shalt.err (!%p1207_p8)
}
  0x42   : > { %s1211_s29 = scalar_lea.vmem %s1461_s28, 1024  ;;  %s1317_s9 = smov [#allocation3]  }
  0x43   : > { %p1212_p12 = scmp.ne.s32.totalorder %s1461_s28, %s1211_s29  ;;  %s1216_s11 = sshll.u32 %s1317_s9, 4  ;;  %s1217_s11 = int_to_ptr.vmem [resolvable:$false] %s1216_s11 }
  0x44   : > { %s1218_s13 = scalar_lea.vmem %s1217_s11, 2048  ;;  %p1219_p5 = scmp.lt.s32.totalorder %s1461_s28, %s1217_s11 }
  0x45   : > { %p1214_p10 = pnand %p1212_p12, %p1198_p3  ;;  %p1220_p9 = scmp.lt.s32.totalorder %s1218_s13, %s1211_s29 }
  0x47   : > { %p1215_p0 = pneg %p1214_p10  ;;  %p1221_p1 = por %p1220_p9, %p1219_p5 }
  0x49   : > { %p1222_p2 = pnand %p1221_p1, %p1215_p0 }
  0x4b   : > { %1225 = shalt.err (!%p1222_p2)
}
  0x4c   : > { %1090 = dma.hbm_to_vmem [thread:$0]  (!%p1465_p13), %s1459_s22, 1024, %s1461_s28, %s1469_s6, %s1315_s14, %s1315_s14, %s1316_s21  }
  0x4d   : > { %p1637_p3 = scmp.ne.s32.totalorder %s1631_s27, 0 }
  0x4e   : > { %s1503_s12 = sand.u32 (!%p1637_p3), 1, %s1296_s16   ;;  %p1638_p7 = scmp.ne.s32.totalorder (!%p1637_p3), %s1629_s25, 0 }
  0x4f   : > { %247 = sbr.rel (%p1637_p3) target bundleno = 370 (0x172), region = 36  ;;  %s904_s7 = sshll.u32 (!%p1637_p3), %s1503_s12, 6 }
  0x50   : > { %s250_s24 = scalar_lea.sflag (!%p1637_p3), [#allocation4], %s1503_s12  ;;  %s1509_s8 = scalar_lea.vmem (!%p1637_p3), [#allocation3], %s904_s7 }
  0x56   : > { %1279 = dma.done.wait (%p1638_p7), %s250_s24, 1024  }
  0x57   : > { %1281 = vsyncadd (%p1638_p7), %s250_s24, 4294966272  ;;  %p1639_p13 = scmp.ne.s32.totalorder %s1627_s23, 0 }
  0x59   : > { %1283 = dma.done.wait (%p1639_p13), [#allocation7], 1024  }
  0x5a   : > { %1285 = vsyncadd (%p1639_p13), [#allocation7], 4294966272  ;;  %v1152_v0 = vld [vmem:[#allocation6] sm:$0xff]   ;;  %v1153_v1 = vld [vmem:[#allocation6 + $0x8] sm:$0xff]   ;;  %s1545_s21 = scalar_lea.vmem [#allocation8], %s904_s7  ;;  %s963_s22 = sshll.u32 %s1304_s18, 10 }
  0x5b   : > { %1027 = vmatprep.subr.bf16.mxu0 %v1152_v0  ;;  %1059 = vmatprep.subr.bf16.mxu1 %v1152_v0  ;;  %v1154_v2 = vld [vmem:[#allocation6 + $0x10] sm:$0xff]   ;;  %v1155_v3 = vld [vmem:[#allocation6 + $0x18] sm:$0xff]   ;;  %v1160_v4 = vld [vmem:[%s1509_s8] sm:$0xff]   ;;  %s767_s28 = sshll.u32 %s1545_s21, 4  ;;  %s1564_s18 = scalar_lea.hbm %s1622_s4, %s963_s22  ;;  %s1566_s28 = int_to_ptr.vmem [resolvable:$true] %s767_s28 }
  0x5c   : > { %1028 = vmatpush3.bf16.msra.mxu0 %v1152_v0  ;;  %1067 = vmatpush3.bf16.msra.mxu1 %v1152_v0  ;;  %v1161_v5 = vld [vmem:[%s1509_s8 + $0x20] sm:$0xff]   ;;  %v1157_v7 = vld [vmem:[#allocation6 + $0x28] sm:$0xff]   ;;  %v1158_v8 = vld [vmem:[#allocation6 + $0x30] sm:$0xff]   ;;  %s753_s9 = scalar_lea.sflag [#allocation5], %s1503_s12  ;;  %s1226_s11 = scalar_lea.vmem %s1566_s28, 1024 }
  0x5d   : > { %1029 = vmatprep.subr.bf16.mxu0 %v1153_v1  ;;  %1060 = vmatprep.subr.bf16.mxu1 %v1153_v1  ;;  %v1156_v6 = vld [vmem:[#allocation6 + $0x20] sm:$0xff]   ;;  %v1159_v9 = vld [vmem:[#allocation6 + $0x38] sm:$0xff]   ;;  %v1162_v10 = vld [vmem:[%s1509_s8 + $0x8] sm:$0xff]   ;;  %p1227_p4 = scmp.ne.s32.totalorder %s1566_s28, %s1226_s11  ;;  %s1318_s13 = smov [#allocation8]  }
  0x5e   : > { %1043 = vmatprep.mubr.bf16.mxu0 %v1160_v4  ;;  %1051 = vmatprep.mubr.bf16.mxu1 %v1161_v5  ;;  %v1163_v11 = vld [vmem:[%s1509_s8 + $0x28] sm:$0xff]   ;;  %v1164_v12 = vld [vmem:[%s1509_s8 + $0x10] sm:$0xff]   ;;  %v1166_v14 = vld [vmem:[%s1509_s8 + $0x18] sm:$0xff]   ;;  %s1230_s7 = sshll.u32 %s1318_s13, 4  ;;  %s1231_s7 = int_to_ptr.vmem [resolvable:$false] %s1230_s7 }
  0x5f   : > { %v1165_v13 = vld [vmem:[%s1509_s8 + $0x30] sm:$0xff]   ;;  %v1167_v15 = vld [vmem:[%s1509_s8 + $0x38] sm:$0xff]   ;;  %v923_v16 = vld [vmem:[%s1620_s2] ss:$0 sm:$0xff]  ;;  %p1228_p6 = pnand %p1227_p4, %p1444_p11  ;;  %s1232_s24 = scalar_lea.vmem %s1231_s7, 2048 }
  0x60   : > { %1030 = vmatpush3.bf16.msra.mxu0 %v1153_v1  ;;  %1068 = vmatpush3.bf16.msra.mxu1 %v1153_v1  ;;  %v1533_v18 = vld [vmem:[%s1621_s3] ss:$0 sm:$0xff]  ;;  %p1233_p12 = scmp.lt.s32.totalorder %s1566_s28, %s1231_s7  ;;  %p1234_p10 = scmp.lt.s32.totalorder %s1232_s24, %s1226_s11 }
  0x61   : > { %1031 = vmatprep.subr.bf16.mxu0 %v1154_v2  ;;  %1061 = vmatprep.subr.bf16.mxu1 %v1154_v2  ;;  %p1229_p8 = pneg %p1228_p6 }
  0x62   : > { %p1235_p0 = por %p1234_p10, %p1233_p12 }
  0x64   : > { %1032 = vmatpush3.bf16.msra.mxu0 %v1154_v2  ;;  %1069 = vmatpush3.bf16.msra.mxu1 %v1154_v2  ;;  %p1236_p5 = pnand %p1235_p0, %p1229_p8 }
  0x65   : > { %1033 = vmatprep.subr.bf16.mxu0 %v1155_v3  ;;  %1062 = vmatprep.subr.bf16.mxu1 %v1155_v3 }
  0x68   : > { %1034 = vmatpush3.bf16.msra.mxu0 %v1155_v3  ;;  %1070 = vmatpush3.bf16.msra.mxu1 %v1155_v3 }
  0x69   : > { %1035 = vmatprep.subr.bf16.mxu0 %v1156_v6  ;;  %1063 = vmatprep.subr.bf16.mxu1 %v1156_v6 }
  0x6c   : > { %1036 = vmatpush3.bf16.msra.mxu0 %v1156_v6  ;;  %1071 = vmatpush3.bf16.msra.mxu1 %v1156_v6 }
  0x6d   : > { %1037 = vmatprep.subr.bf16.mxu0 %v1157_v7  ;;  %1064 = vmatprep.subr.bf16.mxu1 %v1157_v7 }
  0x70   : > { %1038 = vmatpush3.bf16.msra.mxu0 %v1157_v7  ;;  %1072 = vmatpush3.bf16.msra.mxu1 %v1157_v7 }
  0x71   : > { %1039 = vmatprep.subr.bf16.mxu0 %v1158_v8  ;;  %1065 = vmatprep.subr.bf16.mxu1 %v1158_v8 }
  0x74   : > { %1040 = vmatpush3.bf16.msra.mxu0 %v1158_v8  ;;  %1073 = vmatpush3.bf16.msra.mxu1 %v1158_v8 }
  0x75   : > { %1041 = vmatprep.subr.bf16.mxu0 %v1159_v9  ;;  %1066 = vmatprep.subr.bf16.mxu1 %v1159_v9 }
  0x78   : > { %1042 = vmatpush3.bf16.msra.mxu0 %v1159_v9  ;;  %1074 = vmatpush3.bf16.msra.mxu1 %v1159_v9 }
  0x7b   : > { %1044 = vmatmul.mubr.bf16.vlgmr.msra.gmra.mrb[0].mxu0 %v1162_v10  ;;  %1052 = vmatmul.mubr.bf16.vlgmr.msra.gmra.mrb[0].mxu1 %v1163_v11 }
  0x7c   : > { %1047 = vmatprep.mubr.bf16.mxu0 %v1164_v12  ;;  %1055 = vmatprep.mubr.bf16.mxu1 %v1165_v13 }
  0x83   : > { %1048 = vmatmul.mubr.bf16.gmra.mrb[4].mxu0 %v1166_v14  ;;  %1056 = vmatmul.mubr.bf16.gmra.mrb[4].mxu1 %v1167_v15 }
 0x14e   : > { %v1045_v17 = vpop.f32.mrb[0].mxu0  ;;  %v1053_v19 = vpop.f32.mrb[0].mxu1 }
 0x14f   : > { %v619_v20 = vmul.f32 %v1045_v17, %v923_v16  ;;  %v627_v21 = vmul.f32 %v1053_v19, %v923_v16  ;;  %v496_v22 = vpop.f32.mrb[1].mxu0  ;;  %v528_v23 = vpop.f32.mrb[1].mxu1 }
 0x150   : > { %v617_v24 = vmul.f32 %v923_v16, %v496_v22  ;;  %v625_v25 = vmul.f32 %v923_v16, %v528_v23  ;;  %v1046_v26 = vpop.f32.mrb[2].mxu0  ;;  %v1054_v27 = vpop.f32.mrb[2].mxu1 }
 0x151   : > { %v642_v28 = vadd.f32 %v1533_v18, %v619_v20  ;;  %v650_v29 = vadd.f32 %v1533_v18, %v627_v21  ;;  %v620_v30 = vmul.f32 %v1046_v26, %v923_v16  ;;  %v628_v31 = vmul.f32 %v1054_v27, %v923_v16  ;;  %v499_v32 = vpop.f32.mrb[3].mxu0  ;;  %v531_v33 = vpop.f32.mrb[3].mxu1 }
 0x152   : > { %v640_v34 = vadd.f32 %v1533_v18, %v617_v24  ;;  %v648_v35 = vadd.f32 %v1533_v18, %v625_v25  ;;  %v618_v36 = vmul.f32 %v923_v16, %v499_v32  ;;  %v626_v37 = vmul.f32 %v923_v16, %v531_v33 }
 0x153   : > { %v643_v38 = vadd.f32 %v1533_v18, %v620_v30  ;;  %v651_v39 = vadd.f32 %v1533_v18, %v628_v31  ;;  %v658_v42 = vmax.f32 %v642_v28, 0.0  ;;  %v666_v43 = vmax.f32 %v650_v29, 0.0 }
 0x154   : > { %v641_v40 = vadd.f32 %v1533_v18, %v618_v36  ;;  %v649_v41 = vadd.f32 %v1533_v18, %v626_v37  ;;  %v656_v46 = vmax.f32 %v640_v34, 0.0  ;;  %v664_v47 = vmax.f32 %v648_v35, 0.0 }
 0x155   : > { %v659_v44 = vmax.f32 %v643_v38, 0.0  ;;  %v667_v45 = vmax.f32 %v651_v39, 0.0 }
 0x156   : > { %v657_v48 = vmax.f32 %v641_v40, 0.0  ;;  %v665_v49 = vmax.f32 %v649_v41, 0.0  ;;  %v1049_v50 = vpop.f32.mrb[4].mxu0  ;;  %v1057_v51 = vpop.f32.mrb[4].mxu1 }
 0x157   : > { %v972_v52 = vpack.c.bf16 %v659_v44, %v658_v42  ;;  %v992_v53 = vpack.c.bf16 %v667_v45, %v666_v43  ;;  %v623_v54 = vmul.f32 %v1049_v50, %v923_v16  ;;  %v631_v55 = vmul.f32 %v1057_v51, %v923_v16  ;;  %v512_v56 = vpop.f32.mrb[5].mxu0  ;;  %v544_v57 = vpop.f32.mrb[5].mxu1 }
 0x158   : > { %v967_v58 = vpack.c.bf16 %v657_v48, %v656_v46  ;;  %v987_v59 = vpack.c.bf16 %v665_v49, %v664_v47  ;;  %v621_v60 = vmul.f32 %v923_v16, %v512_v56  ;;  %v629_v61 = vmul.f32 %v923_v16, %v544_v57  ;;  %v1050_v62 = vpop.f32.mrb[6].mxu0  ;;  %v1058_v63 = vpop.f32.mrb[6].mxu1 }
 0x159   : > { %1004 = vst [vmem:[%s1545_s21 + $0x8] sm:$0xff] %v972_v52   ;;  %1008 = vst [vmem:[%s1545_s21 + $0x28] sm:$0xff] %v992_v53   ;;  %v646_v0 = vadd.f32 %v1533_v18, %v623_v54  ;;  %v654_v1 = vadd.f32 %v1533_v18, %v631_v55  ;;  %v624_v2 = vmul.f32 %v1050_v62, %v923_v16  ;;  %v515_v4 = vpop.f32.mrb[7].mxu0  ;;  %v547_v5 = vpop.f32.mrb[7].mxu1 }
 0x15a   : > { %v632_v3 = vmul.f32 %v1058_v63, %v923_v16  ;;  %968 = vst [vmem:[%s1545_s21] sm:$0xff] %v967_v58   ;;  %1007 = vst [vmem:[%s1545_s21 + $0x20] sm:$0xff] %v987_v59   ;;  %v644_v6 = vadd.f32 %v1533_v18, %v621_v60  ;;  %v652_v7 = vadd.f32 %v1533_v18, %v629_v61 }
 0x15b   : > { %v622_v8 = vmul.f32 %v923_v16, %v515_v4  ;;  %v630_v9 = vmul.f32 %v923_v16, %v547_v5  ;;  %v647_v10 = vadd.f32 %v1533_v18, %v624_v2  ;;  %v662_v14 = vmax.f32 %v646_v0, 0.0 }
 0x15c   : > { %v655_v11 = vadd.f32 %v1533_v18, %v632_v3  ;;  %v670_v15 = vmax.f32 %v654_v1, 0.0  ;;  %v660_v16 = vmax.f32 %v644_v6, 0.0  ;;  %v668_v20 = vmax.f32 %v652_v7, 0.0 }
 0x15d   : > { %v645_v12 = vadd.f32 %v1533_v18, %v622_v8  ;;  %v653_v13 = vadd.f32 %v1533_v18, %v630_v9  ;;  %v663_v17 = vmax.f32 %v647_v10, 0.0 }
 0x15e   : > { %v671_v19 = vmax.f32 %v655_v11, 0.0 }
 0x15f   : > { %v661_v21 = vmax.f32 %v645_v12, 0.0  ;;  %v669_v22 = vmax.f32 %v653_v13, 0.0  ;;  %v982_v23 = vpack.c.bf16 %v663_v17, %v662_v14 }
 0x160   : > { %v1002_v24 = vpack.c.bf16 %v671_v19, %v670_v15 }
 0x161   : > { %v977_v18 = vpack.c.bf16 %v661_v21, %v660_v16  ;;  %v997_v25 = vpack.c.bf16 %v669_v22, %v668_v20  ;;  %1006 = vst [vmem:[%s1545_s21 + $0x18] sm:$0xff] %v982_v23  }
 0x162   : > { %1010 = vst [vmem:[%s1545_s21 + $0x38] sm:$0xff] %v1002_v24  }
 0x163   : > { %1005 = vst [vmem:[%s1545_s21 + $0x10] sm:$0xff] %v977_v18   ;;  %1009 = vst [vmem:[%s1545_s21 + $0x30] sm:$0xff] %v997_v25  }
 0x164   : > { %1239 = shalt.err (!%p1236_p5)
}
 0x165   : > { %s1240_s8 = scalar_lea.hbm %s1564_s18, 1024  ;;  %s1244_s27 = scalar_lea.hbm %s1622_s4, 4096 }
 0x166   : > { %p1241_p9 = scmp.ne.s32.totalorder %s1564_s18, %s1240_s8  ;;  %p1245_p3 = scmp.lt.u32.totalorder %s1564_s18, %s1622_s4 }
 0x167   : > { %p1246_p7 = scmp.lt.u32.totalorder %s1244_s27, %s1240_s8  ;;  %p1248_p4 = scmp.lt.u32.totalorder %s1240_s8, %s1564_s18 }
 0x168   : > { %p1242_p1 = pnand %p1241_p9, %p1444_p11 }
 0x169   : > { %p1247_p13 = por %p1246_p7, %p1245_p3 }
 0x16a   : > { %p1243_p2 = pneg %p1242_p1 }
 0x16b   : > { %p1249_p6 = por %p1248_p4, %p1247_p13 }
 0x16d   : > { %p1250_p8 = pnand %p1249_p6, %p1243_p2 }
 0x16f   : > { %1253 = shalt.err (!%p1250_p8)
}
 0x170   : > { %s1319_s22 = smov 64   ;;  %s1320_s6 = smov 4  }
 0x171   : > { %1081 = dma.vmem_to_hbm [thread:$0]  (%p1444_p11), %s1566_s28, 1024, %s1564_s18, %s753_s9, %s1319_s22, %s1319_s22, %s1320_s6  }
 0x172 PF: > { %p1098_p12 = scmp.ge.s32.totalorder %s1312_s20, 2  ;;  %s782_s29 = sand.u32 1, %s1292_s15  }
 0x173   : > { %p1640_p10 = scmp.ne.s32.totalorder %s1630_s26, 0  ;;  %s783_s11 = scalar_lea.sflag [#allocation5], %s782_s29 }
 0x175   : > { %p1092_p0 = pnand %p1098_p12, %p1640_p10 }
 0x177   : > { %1287 = dma.done.wait (!%p1092_p0), %s783_s11, 1024  }
 0x178   : > { %1289 = vsyncadd (!%p1092_p0), %s783_s11, 4294966272  ;;  %s21_s20 = sadd.s32 1, %s1312_s20   ;;  %s1641_s15 = smov %s1296_s16 }
 0x179   : > { %p18_p5 = scmp.ge.s32.totalorder %s21_s20, 6   ;;  %s1642_s16 = smov %s1300_s17 }
 0x17a   : > { %s1643_s17 = smov %s1453_s10  ;;  %s1644_s18 = smov %s1308_s19 }
 0x17b   : > { %s1645_s19 = smov %s1647_s5  ;;  %20 = sbr.rel (!%p18_p5) target bundleno = 7 (0x7), region = 100 }
 0x182   :  { %788 = vsyncpa [#allocation4], 1 }
 0x183   :  { %790 = vsyncpa [#allocation4 + $0x1], 1 }
 0x184   :  { %791 = vsyncpa [#allocation7], 1 }
 0x185   :  { %792 = vsyncpa [#allocation5], 1 }
 0x186   :  { %794 = vsyncpa [#allocation5 + $0x1], 1 }

</bundles_post_ra>
